<compile_context>
chip_gen: v5e
topology: v5e:2x2
jax: 0.10.0
libtpu: 0.0.40
codegen_flags: <defaults>
</compile_context>

<pallas_src>
import functools

import jax
import jax.numpy as jnp
from jax.experimental import pallas as pl
from jax.experimental.pallas import tpu as pltpu

LANE = 128
MAX_TILE_ROWS = 1024  # (1024, 128) f32 = 512 KiB per input block


def _bce_kernel(p_ref, t_ref, o_ref, *, tile_rows, full_rows, rem, needs_mask):
    i = pl.program_id(1)

    @pl.when(i == 0)
    def _():
        o_ref[...] = jnp.zeros_like(o_ref)

    p = p_ref[...].astype(jnp.float32)
    t = t_ref[...].astype(jnp.float32)

    # torch.nn.BCELoss clamps each log term at -100.
    log_p = jnp.maximum(jnp.log(p), -100.0)
    log_1mp = jnp.maximum(jnp.log(1.0 - p), -100.0)
    # -(t*log(p) + (1-t)*log(1-p)) == -(t*(log(p) - log(1-p)) + log(1-p))
    loss = -(t * (log_p - log_1mp) + log_1mp)

    if needs_mask:
        # Mask out the ragged tail / OOB rows of partial (or clamped) tiles.
        gt = pl.program_id(0) * pl.num_programs(1) + i  # global tile index
        row = gt * tile_rows + jax.lax.broadcasted_iota(jnp.int32, loss.shape, 0)
        col = jax.lax.broadcasted_iota(jnp.int32, loss.shape, 1)
        valid = (row < full_rows) | ((row == full_rows) & (col < rem))
        loss = jnp.where(valid, loss, 0.0)

    # Fold the (tile_rows, 128) tile onto the resident (8, 128) accumulator
    # block with plain VPU adds — no cross-lane work in the steady state.
    o_ref[...] += loss.reshape(tile_rows // 8, 8, LANE).sum(axis=0)


def bce_loss_mean(probs: jax.Array, target: jax.Array) -> jax.Array:
    """Mean-reduced BCE loss (matches torch.nn.BCELoss default)."""
    assert probs.shape == target.shape
    total_n = probs.size

    p_flat = probs.reshape(-1)
    t_flat = target.reshape(-1)

    # Pad only up to the next multiple of 128 lanes (cheap, <128 elements and
    # usually a no-op for NCHW tensors); padded elements are masked in-kernel.
    rem_lane = total_n % LANE
    if rem_lane:
        pad = LANE - rem_lane
        p_flat = jnp.pad(p_flat, (0, pad))
        t_flat = jnp.pad(t_flat, (0, pad))

    rows = p_flat.size // LANE
    p2 = p_flat.reshape(rows, LANE)
    t2 = t_flat.reshape(rows, LANE)

    # Tile rows: as large as possible (amortize per-step overhead), but no
    # larger than the (8-aligned) row count for small inputs.
    tile_rows = min(MAX_TILE_ROWS, ((rows + 7) // 8) * 8)
    total_tiles = pl.cdiv(rows, tile_rows)

    # Split tiles into 2 groups along a leading "parallel" axis so both
    # TensorCores are used on v7x; single group for tiny inputs.
    n_splits = 2 if total_tiles >= 2 else 1
    inner = pl.cdiv(total_tiles, n_splits)

    # Only pay for in-kernel masking when some tile covers non-data elements.
    needs_mask = (n_splits * inner * tile_rows * LANE) != total_n

    kernel = functools.partial(
        _bce_kernel,
        tile_rows=tile_rows,
        full_rows=total_n // LANE,
        rem=total_n % LANE,
        needs_mask=needs_mask,
    )

    def in_map(c, i):
        # Clamp so a (fully masked) duplicate tile is read instead of an
        # out-of-bounds block when total_tiles is odd.
        return (jnp.minimum(c * inner + i, total_tiles - 1), 0)

    partials = pl.pallas_call(
        kernel,
        out_shape=jax.ShapeDtypeStruct((n_splits * 8, LANE), jnp.float32),
        grid_spec=pltpu.PrefetchScalarGridSpec(
            num_scalar_prefetch=0,
            grid=(n_splits, inner),
            in_specs=[
                pl.BlockSpec((tile_rows, LANE), in_map),
                pl.BlockSpec((tile_rows, LANE), in_map),
            ],
            # Output block depends only on the parallel axis -> it stays
            # resident across the reduction axis and acts as the accumulator.
            out_specs=pl.BlockSpec((8, LANE), lambda c, i: (c, 0)),
        ),
        compiler_params=pltpu.CompilerParams(
            dimension_semantics=("parallel", "arbitrary"),
        ),
    )(p2, t2)

    # Tiny final reduction + mean division in the wrapper.
    return jnp.sum(partials) / jnp.float32(total_n)


def bce_criterion_forward(output: dict, batch: dict) -> dict:
    """Pallas equivalent of BCECriterion.forward (default BCELoss args)."""
    # TODO(synk): nn.BCELoss weight= / reduction != 'mean' ctor args not implemented.
    bce = bce_loss_mean(output["logits"], batch["target"])
    return {"total_loss": bce, "losses": {"bce": bce}}


def _reference(probs, target):
    log_p = jnp.maximum(jnp.log(probs), -100.0)
    log_1mp = jnp.maximum(jnp.log(1.0 - probs), -100.0)
    return jnp.mean(-(target * log_p + (1.0 - target) * log_1mp))


if __name__ == "__main__":
    key = jax.random.PRNGKey(0)

    shapes = [
        (2, 4, 16, 16),   # primary NCHW test case
        (3, 5, 7, 9),     # ragged: numel % 128 != 0 (lane pad + mask path)
        (4, 4, 96, 90),   # multi-tile: exercises the 2-way split + partial tile
    ]
    for idx, shape in enumerate(shapes):
        k1, k2 = jax.random.split(jax.random.fold_in(key, idx))
        probs = jax.nn.sigmoid(jax.random.normal(k1, shape, dtype=jnp.float32))
        target = (jax.random.uniform(k2, shape) > 0.5).astype(jnp.float32)

        result = bce_criterion_forward({"logits": probs}, {"target": target})
        loss = jax.block_until_ready(result["total_loss"])
        ref = _reference(probs, target)
        assert jnp.allclose(loss, ref, atol=1e-6, rtol=1e-4), (shape, loss, ref)

    print("KERNEL_OK")
</pallas_src>

<mosaic_0001>
module attributes {stable_mosaic.version = 11 : i64} {
  func.func @_bce_kernel(%arg0: i32, %arg1: i32, %arg2: memref<16x128xf32, #tpu.memory_space<vmem>>, %arg3: memref<16x128xf32, #tpu.memory_space<vmem>>, %arg4: memref<8x128xf32, #tpu.memory_space<vmem>>) attributes {dimension_semantics = [#tpu.dimension_semantics<parallel>, #tpu.dimension_semantics<arbitrary>], iteration_bounds = array<i64: 1, 1>, scalar_prefetch = 0 : i64, scratch_operands = 0 : i64, tpu.core_type = #tpu.core_type<tc>, window_params = [{transform_indices = @transform_0, window_bounds = array<i64: 16, 128>}, {transform_indices = @transform_1, window_bounds = array<i64: 16, 128>}, {transform_indices = @transform_2, window_bounds = array<i64: 8, 128>}]} {
    %c0_i32 = arith.constant 0 : i32
    %0 = arith.cmpi eq, %arg1, %c0_i32 : i32
    %1 = arith.extui %0 : i1 to i32
    %c0_i32_0 = arith.constant 0 : i32
    %2 = arith.cmpi ne, %1, %c0_i32_0 : i32
    scf.if %2 {
      %cst_12 = arith.constant 0.000000e+00 : f32
      %23 = vector.broadcast %cst_12 : f32 to vector<8x128xf32>
      %c0_13 = arith.constant 0 : index
      %c0_14 = arith.constant 0 : index
      %24 = vector.load %arg4[%c0_13, %c0_14] : memref<8x128xf32, #tpu.memory_space<vmem>>, vector<8x128xf32>
      tpu.vector_store %arg4[%c0_13, %c0_14], %23 {strides = array<i32>} : memref<8x128xf32, #tpu.memory_space<vmem>>, vector<8x128xf32>,
    } else {
    }
    %c0 = arith.constant 0 : index
    %c0_1 = arith.constant 0 : index
    %3 = vector.load %arg2[%c0, %c0_1] : memref<16x128xf32, #tpu.memory_space<vmem>>, vector<16x128xf32>
    %c0_2 = arith.constant 0 : index
    %c0_3 = arith.constant 0 : index
    %4 = vector.load %arg3[%c0_2, %c0_3] : memref<16x128xf32, #tpu.memory_space<vmem>>, vector<16x128xf32>
    %5 = math.log %3 : vector<16x128xf32>
    %cst = arith.constant -1.000000e+02 : f32
    %6 = vector.broadcast %cst : f32 to vector<16x128xf32>
    %7 = arith.maximumf %5, %6 : vector<16x128xf32>
    %cst_4 = arith.constant 1.000000e+00 : f32
    %8 = vector.broadcast %cst_4 : f32 to vector<16x128xf32>
    %9 = arith.subf %8, %3 : vector<16x128xf32>
    %10 = math.log %9 : vector<16x128xf32>
    %cst_5 = arith.constant -1.000000e+02 : f32
    %11 = vector.broadcast %cst_5 : f32 to vector<16x128xf32>
    %12 = arith.maximumf %10, %11 : vector<16x128xf32>
    %13 = arith.subf %7, %12 : vector<16x128xf32>
    %14 = arith.mulf %4, %13 : vector<16x128xf32>
    %15 = arith.addf %14, %12 : vector<16x128xf32>
    %cst_6 = arith.constant 0.000000e+00 : f32
    %16 = vector.broadcast %cst_6 : f32 to vector<16x128xf32>
    %17 = arith.subf %16, %15 : vector<16x128xf32>
    %c0_7 = arith.constant 0 : index
    %c0_8 = arith.constant 0 : index
    %18 = vector.load %arg4[%c0_7, %c0_8] : memref<8x128xf32, #tpu.memory_space<vmem>>, vector<8x128xf32>
    %19 = vector.shape_cast %17 : vector<16x128xf32> to vector<2x8x128xf32>
    %cst_9 = arith.constant dense<0.000000e+00> : vector<8x128xf32>
    %20 = vector.multi_reduction <add>, %19, %cst_9 [0] : vector<2x8x128xf32> to vector<8x128xf32>
    %21 = arith.addf %18, %20 : vector<8x128xf32>
    %c0_10 = arith.constant 0 : index
    %c0_11 = arith.constant 0 : index
    %22 = vector.load %arg4[%c0_10, %c0_11] : memref<8x128xf32, #tpu.memory_space<vmem>>, vector<8x128xf32>
    tpu.vector_store %arg4[%c0_10, %c0_11], %21 {strides = array<i32>} : memref<8x128xf32, #tpu.memory_space<vmem>>, vector<8x128xf32>,
    return
  }
  func.func @transform_0(%arg0: i32, %arg1: i32) -> (i32, i32) {
    %c1_i32 = arith.constant 1 : i32
    %0 = arith.muli %arg0, %c1_i32 : i32
    %1 = arith.addi %0, %arg1 : i32
    %c0_i32 = arith.constant 0 : i32
    %2 = arith.minsi %1, %c0_i32 : i32
    %c0_i32_0 = arith.constant 0 : i32
    %c0_i32_1 = arith.constant 0 : i32
    return %2, %c0_i32_0 : i32, i32
  }
  func.func @transform_1(%arg0: i32, %arg1: i32) -> (i32, i32) {
    %c1_i32 = arith.constant 1 : i32
    %0 = arith.muli %arg0, %c1_i32 : i32
    %1 = arith.addi %0, %arg1 : i32
    %c0_i32 = arith.constant 0 : i32
    %2 = arith.minsi %1, %c0_i32 : i32
    %c0_i32_0 = arith.constant 0 : i32
    %c0_i32_1 = arith.constant 0 : i32
    return %2, %c0_i32_0 : i32, i32
  }
  func.func @transform_2(%arg0: i32, %arg1: i32) -> (i32, i32) {
    %c0_i32 = arith.constant 0 : i32
    %c0_i32_0 = arith.constant 0 : i32
    return %arg0, %c0_i32 : i32, i32
  }
}

</mosaic_0001>

<bundles_post_ra>
// kernel: tpu_custom_call.1
= control target key start
LH: loop header
LB: loop body
LE: loop exit
PB: predicated region body
PF: predicated region fallthrough
CT: control target
= control target key end

     0   :  { %7 = vsyncpa [#allocation3], 0  ;;  %s242_s0 = inlined_call_operand.hbm [shape: f32[16,128], index: 0, kind: input, shape index: {}]   ;;  %s243_s1 = inlined_call_operand.hbm [shape: f32[16,128], index: 1, kind: input, shape index: {}]   ;;  %s244_s2 = inlined_call_operand.hbm [shape: f32[8,128], index: 2, kind: output, shape index: {}]  }
   0x1   :  { %8 = vsyncpa [#allocation6], 0 }
   0x2   :  { %9 = vsyncpa [#allocation4], 0  ;;  %s20_s11 = sshll.u32 %s242_s0, 4  ;;  %s213_s12 = smov [#allocation2]   ;;  %s21_s11 = int_to_ptr.hbm [resolvable:$true] %s20_s11 }
   0x3   :  { %s22_s13 = sshll.u32 %s213_s12, 4  ;;  %s39_s16 = sshll.u32 %s243_s1, 4  ;;  %s23_s13 = int_to_ptr.vmem [resolvable:$true] %s22_s13  ;;  %s40_s16 = int_to_ptr.hbm [resolvable:$true] %s39_s16 }
   0x4   :  { %s214_s17 = smov 128   ;;  %s215_s18 = smov 8  }
   0x5   :  { %28 = dma.hbm_to_vmem [thread:$0]  %s21_s11, 256, %s23_s13, [#allocation3], %s214_s17, %s214_s17, %s215_s18  }
   0x6   :  { %s216_s19 = smov [#allocation5]  }
   0x7   :  { %s41_s20 = sshll.u32 %s216_s19, 4  ;;  %s42_s20 = int_to_ptr.vmem [resolvable:$true] %s41_s20 }
   0x8   :  { %47 = dma.hbm_to_vmem [thread:$0]  %s40_s16, 256, %s42_s20, [#allocation6], %s214_s17, %s214_s17, %s215_s18  }
   0x9   :  { %207 = dma.done.wait [#allocation3], 256  }
   0xa   :  { %208 = vsyncadd [#allocation3], 4294967040 }
   0xb   :  { %209 = dma.done.wait [#allocation6], 256  }
   0xc   :  { %210 = vsyncadd [#allocation6], 4294967040  ;;  %v69_v0 = vld [vmem:[#allocation2] sm:$0xff]  ;;  %v70_v1 = vld [vmem:[#allocation2 + $0x8] sm:$0xff]  ;;  %s217_s0 = smov [#allocation7]   ;;  %s106_s23 = sshll.u32 %s244_s2, 4  ;;  %s107_s23 = int_to_ptr.hbm [resolvable:$true] %s106_s23 }
   0xd   :  { %127 = vlog2.f32 %v69_v0  ;;  %v79_v2 = vsub.f32 1.0, %v69_v0  ;;  %v80_v3 = vsub.f32 1.0, %v70_v1  ;;  %v71_v15 = vld [vmem:[#allocation5] sm:$0xff]  ;;  %v72_v17 = vld [vmem:[#allocation5 + $0x8] sm:$0xff]  ;;  %s104_s1 = sshll.u32 %s217_s0, 4  ;;  %s105_s1 = int_to_ptr.vmem [resolvable:$true] %s104_s1 }
   0xe   :  { %129 = vlog2.f32 %v70_v1 }
   0xf   :  { %131 = vlog2.f32 %v79_v2 }
  0x10   :  { %133 = vlog2.f32 %v80_v3 }
  0x13   :  { %v128_v4 = vpop.eup %127 }
  0x14   :  { %v130_v5 = vpop.eup %129  ;;  %v74_v6 = vmul.f32 0.6931472, %v128_v4 }
  0x15   :  { %v132_v7 = vpop.eup %131  ;;  %v76_v8 = vmul.f32 0.6931472, %v130_v5 }
  0x16   :  { %v134_v9 = vpop.eup %133  ;;  %v77_v10 = vmax.f32 %v74_v6, -100.0  ;;  %v82_v11 = vmul.f32 0.6931472, %v132_v7 }
  0x17   :  { %v78_v12 = vmax.f32 %v76_v8, -100.0  ;;  %v84_v13 = vmul.f32 0.6931472, %v134_v9 }
  0x18   :  { %v85_v14 = vmax.f32 %v82_v11, -100.0 }
  0x19   :  { %v86_v16 = vmax.f32 %v84_v13, -100.0 }
  0x1a   :  { %v87_v18 = vsub.f32 %v77_v10, %v85_v14 }
  0x1b   :  { %v88_v19 = vsub.f32 %v78_v12, %v86_v16 }
  0x1c   :  { %v89_v20 = vmul.f32 %v87_v18, %v71_v15 }
  0x1d   :  { %v90_v21 = vmul.f32 %v88_v19, %v72_v17 }
  0x1e   :  { %v91_v22 = vadd.f32 %v89_v20, %v85_v14 }
  0x1f   :  { %v92_v23 = vadd.f32 %v90_v21, %v86_v16 }
  0x20   :  { %v93_v24 = vsub.f32 0.0, %v91_v22 }
  0x21   :  { %v94_v25 = vsub.f32 0.0, %v92_v23 }
  0x23   :  { %v96_v26 = vadd.f32 %v94_v25, %v93_v24 }
  0x25   :  { %98 = vst [vmem:[#allocation7] sm:$0xff] %v96_v26 }
  0x26   :  { %109 = dma.vmem_to_hbm [thread:$0]  %s105_s1, 128, %s107_s23, [#allocation4]  }
  0x27   :  { %211 = dma.done.wait [#allocation4], 128  }
  0x28   :  { %212 = vsyncadd [#allocation4], 4294967168 }
  0x29   :  { %114 = vsyncpa [#allocation3], 1 }
  0x2a   :  { %115 = vsyncpa [#allocation6], 1 }
  0x2b   :  { %116 = vsyncpa [#allocation4], 1 }

</bundles_post_ra>
